<compile_context>
chip_gen: v7x
topology: tpu7x:2x2x1
jax: 0.10.0
libtpu: 0.0.40
codegen_flags: <defaults>
</compile_context>

<pallas_src>
import functools

import jax
import jax.numpy as jnp
from jax.experimental import pallas as pl
from jax.experimental.pallas import tpu as pltpu


# ---------------------------------------------------------------------------
# Pass A: tile-parallel global reductions.
# ---------------------------------------------------------------------------
def _reduce_kernel(*refs, shared):
    if shared:
        (x_ref, wq_ref, bq_ref, wk_ref, bk_ref, wv_ref, bv_ref,
         kv_ref, st_ref) = refs
        xq = x_ref[...]
        xs = xq
    else:
        (xq_ref, xs_ref, wq_ref, bq_ref, wk_ref, bk_ref, wv_ref, bv_ref,
         kv_ref, st_ref) = refs
        xq = xq_ref[...]
        xs = xs_ref[...]

    # bf16 MXU feeds, f32 accumulation; biases added in f32.
    q = jnp.dot(xq, wq_ref[...], preferred_element_type=jnp.float32) + bq_ref[...]
    k = jnp.dot(xs, wk_ref[...], preferred_element_type=jnp.float32) + bk_ref[...]
    v = jnp.dot(xs, wv_ref[...], preferred_element_type=jnp.float32) + bv_ref[...]

    hm = q.shape[1]
    # Per-lane (sublane-only) partials; the single cross-lane reduce happens
    # once in the JAX glue, not per tile.
    qss = jnp.sum(q * q, axis=0, keepdims=True)           # [1, HM]
    kss = jnp.sum(k * k, axis=0, keepdims=True)           # [1, HM]
    ksum = jnp.sum(k, axis=0, keepdims=True)              # [1, HM]
    st_ref[0] = jnp.concatenate(
        [qss, kss, ksum, jnp.zeros((5, hm), jnp.float32)], axis=0)

    # Raw (un-normalized, un-masked) kvs partial: contract over the node axis
    # directly on the MXU, bf16 operands, f32 accumulation.
    kv_ref[0] = jax.lax.dot_general(
        k.astype(jnp.bfloat16), v.astype(jnp.bfloat16),
        dimension_numbers=(((0,), (0,)), ((), ())),
        preferred_element_type=jnp.float32)


# ---------------------------------------------------------------------------
# Pass B: tile-parallel output using the folded (constant) weights.
#   num   = xq @ W_num (+ xs @ (N*Wv)) + b_num
#   denom = xq @ W_den + b_den            (b_den already includes +N)
#   out   = head_mean(num / denom)        -> (tile_n, out_channels)
# ---------------------------------------------------------------------------
def _output_kernel(*refs, num_heads, out_channels, shared):
    if shared:
        (x_ref, wnum_ref, bnum_ref, wden_ref, bden_ref, out_ref) = refs
        xq = x_ref[...]
        num = jnp.dot(xq, wnum_ref[...],
                      preferred_element_type=jnp.float32) + bnum_ref[...]
    else:
        (xq_ref, xs_ref, wnum_ref, bnum_ref, wden_ref, bden_ref, wvn_ref,
         out_ref) = refs
        xq = xq_ref[...]
        num = (jnp.dot(xq, wnum_ref[...], preferred_element_type=jnp.float32)
               + jnp.dot(xs_ref[...], wvn_ref[...],
                         preferred_element_type=jnp.float32)
               + bnum_ref[...])
    den = jnp.dot(xq, wden_ref[...],
                  preferred_element_type=jnp.float32) + bden_ref[...]

    # EUP approximate reciprocal + one Newton step (near-f32 accuracy).
    r = pl.reciprocal(den, approx=True)
    r = r * (2.0 - den * r)
    attn = num * r                                         # [tile, HM]

    # Head-mean via a block-diagonal averaging matrix built in-kernel (no HBM
    # stream / resident VMEM constant); single MXU matmul into the unpadded
    # (tile, out_channels) output block.
    hm = attn.shape[1]
    row = jax.lax.broadcasted_iota(jnp.int32, (hm, out_channels), 0)
    col = jax.lax.broadcasted_iota(jnp.int32, (hm, out_channels), 1)
    avg = ((row % out_channels) == col).astype(jnp.float32) * (1.0 / num_heads)
    out_ref[...] = jnp.dot(attn, avg, preferred_element_type=jnp.float32)


# ---------------------------------------------------------------------------
# Per-generation tile / VMEM selection.
# ---------------------------------------------------------------------------
def _pick_tile_and_vmem(n_nodes, cin, hm, out_ch, shared):
    try:
        cap = getattr(pltpu.get_tpu_info(), "vmem_capacity_bytes",
                      64 * 1024 * 1024)
    except Exception:  # pragma: no cover - conservative fallback
        cap = 64 * 1024 * 1024
    if cap >= 100 * 1024 * 1024:          # v5e / v6e: 128 MiB VMEM
        vmem_limit = 96 * 1024 * 1024
        candidates = (8192, 4096, 2048, 1024, 512, 256, 128)
    else:                                  # v7x: 64 MiB physical VMEM
        vmem_limit = 48 * 1024 * 1024
        candidates = (4096, 2048, 1024, 512, 256, 128)

    n_streams = 1 if shared else 2

    def step_bytes(t):
        x_tiles = n_streams * 2 * t * cin * 2   # bf16 inputs, double-buffered
        qkv = 3 * t * hm * 4                    # f32 q/k/v intermediates (A)
        out = 2 * t * out_ch * 4                # pass-B output buffers
        return x_tiles + qkv + out

    tile = n_nodes
    for c in candidates:
        if n_nodes % c == 0 and step_bytes(c) <= int(0.45 * vmem_limit):
            tile = c
            break
    return tile, vmem_limit


# ---------------------------------------------------------------------------
# Wrapper: two pallas_calls + tiny JAX glue (combine + weight folding).
# ---------------------------------------------------------------------------
def trans_conv_layer(query_input, source_input, params, *, num_heads,
                     out_channels, tile_n=None):
    wq, bq, wk, bk, wv, bv = params           # [Cin, H*M] / [1, H*M], f32
    n_nodes, cin = query_input.shape
    assert source_input.shape == (n_nodes, cin), "module contract: L == N"
    hm = num_heads * out_channels
    shared = query_input is source_input      # SGFormer often calls (x, x)

    auto_tile, vmem_limit = _pick_tile_and_vmem(n_nodes, cin, hm,
                                                out_channels, shared)
    tile = auto_tile if tile_n is None else tile_n
    assert n_nodes % tile == 0, (n_nodes, tile)
    n_tiles = n_nodes // tile

    f32, bf16 = jnp.float32, jnp.bfloat16
    # bf16 HBM streams + bf16 MXU feeds (f32 accumulation inside the kernels).
    xq16 = query_input.astype(bf16)
    xs16 = xq16 if shared else source_input.astype(bf16)
    wq16, wk16, wv16 = wq.astype(bf16), wk.astype(bf16), wv.astype(bf16)

    cparams = pltpu.CompilerParams(
        dimension_semantics=("parallel",),
        vmem_limit_bytes=vmem_limit,
    )

    x_spec = pl.BlockSpec((tile, cin), lambda i: (i, 0))
    w_spec = pl.BlockSpec((cin, hm), lambda i: (0, 0))
    b_spec = pl.BlockSpec((1, hm), lambda i: (0, 0))

    # ---- pass A: tile-parallel global reductions --------------------------
    a_kernel = functools.partial(_reduce_kernel, shared=shared)
    a_inputs = ([xq16] if shared else [xq16, xs16]) + \
               [wq16, bq, wk16, bk, wv16, bv]
    a_in_specs = ([x_spec] if shared else [x_spec, x_spec]) + \
                 [w_spec, b_spec, w_spec, b_spec, w_spec, b_spec]
    kv_parts, stat_parts = pl.pallas_call(
        a_kernel,
        grid=(n_tiles,),
        in_specs=a_in_specs,
        out_specs=[pl.BlockSpec((1, hm, hm), lambda i: (i, 0, 0)),
                   pl.BlockSpec((1, 8, hm), lambda i: (i, 0, 0))],
        out_shape=[jax.ShapeDtypeStruct((n_tiles, hm, hm), f32),
                   jax.ShapeDtypeStruct((n_tiles, 8, hm), f32)],
        compiler_params=cparams,
    )(*a_inputs)

    # ---- JAX glue: combine partials, fold globals into K=Cin weights ------
    head = jnp.arange(hm) // out_channels
    mask = (head[:, None] == head[None, :]).astype(f32)     # block-diag ones
    kv = kv_parts.sum(axis=0) * mask                         # [HM, HM]
    stats = stat_parts.sum(axis=0)                            # [8, HM]
    inv_qk = jax.lax.rsqrt(stats[0].sum() * stats[1].sum())   # 1/(||q||*||k||)
    d_mat = stats[2][:, None] * mask                          # diag(ks_sum)@mask
    n_f = f32(n_nodes)

    w_num = inv_qk * (wq @ kv)                                # [Cin, HM]
    b_num = inv_qk * (bq @ kv) + n_f * bv                     # [1, HM]
    w_den = inv_qk * (wq @ d_mat)                             # [Cin, HM]
    b_den = inv_qk * (bq @ d_mat) + n_f                       # [1, HM]

    # ---- pass B: tile-parallel output --------------------------------------
    b_kernel = functools.partial(_output_kernel, num_heads=num_heads,
                                 out_channels=out_channels, shared=shared)
    if shared:
        w_num = w_num + n_f * wv                              # fold N*Wv too
        b_inputs = [xq16, w_num.astype(bf16), b_num, w_den.astype(bf16), b_den]
        b_in_specs = [x_spec, w_spec, b_spec, w_spec, b_spec]
    else:
        b_inputs = [xq16, xs16, w_num.astype(bf16), b_num,
                    w_den.astype(bf16), b_den, (n_f * wv).astype(bf16)]
        b_in_specs = [x_spec, x_spec, w_spec, b_spec, w_spec, b_spec, w_spec]

    out = pl.pallas_call(
        b_kernel,
        grid=(n_tiles,),
        in_specs=b_in_specs,
        out_specs=pl.BlockSpec((tile, out_channels), lambda i: (i, 0)),
        out_shape=jax.ShapeDtypeStruct((n_nodes, out_channels), f32),
        compiler_params=cparams,
    )(*b_inputs)
    return out


def trans_conv_reference(xq, xs, params, *, num_heads, out_channels):
    """Pure-JAX f32 transliteration of the PyTorch forward (use_weight=True)."""
    wq, bq, wk, bk, wv, bv = params
    H, M = num_heads, out_channels
    qs = (xq @ wq + bq).reshape(-1, H, M)
    ks = (xs @ wk + bk).reshape(-1, H, M)
    vs = (xs @ wv + bv).reshape(-1, H, M)
    qs = qs / jnp.linalg.norm(qs)
    ks = ks / jnp.linalg.norm(ks)
    N = qs.shape[0]
    kvs = jnp.einsum('lhm,lhd->hmd', ks, vs)
    attention_num = jnp.einsum('nhm,hmd->nhd', qs, kvs) + N * vs
    ks_sum = jnp.einsum('lhm,l->hm', ks, jnp.ones((ks.shape[0],), jnp.float32))
    attention_normalizer = jnp.einsum('nhm,hm->nh', qs, ks_sum)[..., None] + N
    attn_output = attention_num / attention_normalizer
    return attn_output.mean(axis=1)


if __name__ == "__main__":
    # Small shapes consistent with the module's forward; N is tiled into 2
    # blocks so the tile-parallel grids are exercised.
    N_NODES = 256
    IN_CH = 32
    OUT_CH = 32
    HEADS = 4
    HM = OUT_CH * HEADS

    key = jax.random.PRNGKey(0)
    kxq, kxs, kwq, kbq, kwk, kbk, kwv, kbv = jax.random.split(key, 8)

    xq = jax.random.normal(kxq, (N_NODES, IN_CH), jnp.float32)
    xs = jax.random.normal(kxs, (N_NODES, IN_CH), jnp.float32)

    # Deterministic nn.Linear-like init, weights stored [Cin, H*M].
    scale = 1.0 / jnp.sqrt(jnp.float32(IN_CH))
    params = (
        jax.random.uniform(kwq, (IN_CH, HM), jnp.float32, -scale, scale),
        jax.random.uniform(kbq, (1, HM), jnp.float32, -scale, scale),
        jax.random.uniform(kwk, (IN_CH, HM), jnp.float32, -scale, scale),
        jax.random.uniform(kbk, (1, HM), jnp.float32, -scale, scale),
        jax.random.uniform(kwv, (IN_CH, HM), jnp.float32, -scale, scale),
        jax.random.uniform(kbv, (1, HM), jnp.float32, -scale, scale),
    )

    # Tolerance budget: bf16 MXU feeds / bf16 input & folded-weight rounding
    # (Newton-corrected reciprocal is near-f32); everything else accumulates
    # in f32.
    ATOL = RTOL = 2.5e-2

    # General path (query != source).
    out = trans_conv_layer(xq, xs, params, num_heads=HEADS,
                           out_channels=OUT_CH, tile_n=128)
    out = jax.block_until_ready(out)
    ref = trans_conv_reference(xq, xs, params, num_heads=HEADS,
                               out_channels=OUT_CH)
    assert out.shape == (N_NODES, OUT_CH), out.shape
    err = float(jnp.max(jnp.abs(out - ref)))
    assert jnp.allclose(out, ref, atol=ATOL, rtol=RTOL), err

    # Shared fast path (query is source): one input stream, N*Wv folded.
    out_s = trans_conv_layer(xq, xq, params, num_heads=HEADS,
                             out_channels=OUT_CH, tile_n=128)
    out_s = jax.block_until_ready(out_s)
    ref_s = trans_conv_reference(xq, xq, params, num_heads=HEADS,
                                 out_channels=OUT_CH)
    err_s = float(jnp.max(jnp.abs(out_s - ref_s)))
    assert jnp.allclose(out_s, ref_s, atol=ATOL, rtol=RTOL), err_s

    print("KERNEL_OK")
</pallas_src>

<mosaic_0001>
module attributes {stable_mosaic.version = 11 : i64} {
  func.func @_reduce_kernel(%arg0: i32, %arg1: memref<128x32xbf16, #tpu.memory_space<vmem>>, %arg2: memref<128x32xbf16, #tpu.memory_space<vmem>>, %arg3: memref<32x128xbf16, #tpu.memory_space<vmem>>, %arg4: memref<1x128xf32, #tpu.memory_space<vmem>>, %arg5: memref<32x128xbf16, #tpu.memory_space<vmem>>, %arg6: memref<1x128xf32, #tpu.memory_space<vmem>>, %arg7: memref<32x128xbf16, #tpu.memory_space<vmem>>, %arg8: memref<1x128xf32, #tpu.memory_space<vmem>>, %arg9: memref<1x128x128xf32, #tpu.memory_space<vmem>>, %arg10: memref<1x8x128xf32, #tpu.memory_space<vmem>>) attributes {dimension_semantics = [#tpu.dimension_semantics<parallel>], iteration_bounds = array<i64: 2>, scalar_prefetch = 0 : i64, scratch_operands = 0 : i64, tpu.core_type = #tpu.core_type<tc>, window_params = [{transform_indices = @transform_0, window_bounds = array<i64: 128, 32>}, {transform_indices = @transform_1, window_bounds = array<i64: 128, 32>}, {pipeline_mode = #tpu.pipeline_mode<synchronous>, transform_indices = @transform_2, window_bounds = array<i64: 32, 128>}, {pipeline_mode = #tpu.pipeline_mode<synchronous>, transform_indices = @transform_3, window_bounds = array<i64: 1, 128>}, {pipeline_mode = #tpu.pipeline_mode<synchronous>, transform_indices = @transform_4, window_bounds = array<i64: 32, 128>}, {pipeline_mode = #tpu.pipeline_mode<synchronous>, transform_indices = @transform_5, window_bounds = array<i64: 1, 128>}, {pipeline_mode = #tpu.pipeline_mode<synchronous>, transform_indices = @transform_6, window_bounds = array<i64: 32, 128>}, {pipeline_mode = #tpu.pipeline_mode<synchronous>, transform_indices = @transform_7, window_bounds = array<i64: 1, 128>}, {transform_indices = @transform_8, window_bounds = array<i64: 1, 128, 128>}, {transform_indices = @transform_9, window_bounds = array<i64: 1, 8, 128>}]} {
    %c0 = arith.constant 0 : index
    %c0_0 = arith.constant 0 : index
    %0 = vector.load %arg1[%c0, %c0_0] : memref<128x32xbf16, #tpu.memory_space<vmem>>, vector<128x32xbf16>
    %c0_1 = arith.constant 0 : index
    %c0_2 = arith.constant 0 : index
    %1 = vector.load %arg2[%c0_1, %c0_2] : memref<128x32xbf16, #tpu.memory_space<vmem>>, vector<128x32xbf16>
    %c0_3 = arith.constant 0 : index
    %c0_4 = arith.constant 0 : index
    %2 = vector.load %arg3[%c0_3, %c0_4] : memref<32x128xbf16, #tpu.memory_space<vmem>>, vector<32x128xbf16>
    %cst = arith.constant dense<0.000000e+00> : vector<128x128xf32>
    %3 = tpu.matmul %0, %2, %cst {dimension_numbers = #tpu.dot_dimension_numbers<[1], [0], [0], [1], [0, 0, 1, 1], [], []>} : vector<128x32xbf16>, vector<32x128xbf16>, vector<128x128xf32> -> vector<128x128xf32>
    %c0_5 = arith.constant 0 : index
    %c0_6 = arith.constant 0 : index
    %4 = vector.load %arg4[%c0_5, %c0_6] : memref<1x128xf32, #tpu.memory_space<vmem>>, vector<1x128xf32>
    %5 = vector.broadcast %4 : vector<1x128xf32> to vector<128x128xf32>
    %6 = arith.addf %3, %5 : vector<128x128xf32>
    %c0_7 = arith.constant 0 : index
    %c0_8 = arith.constant 0 : index
    %7 = vector.load %arg5[%c0_7, %c0_8] : memref<32x128xbf16, #tpu.memory_space<vmem>>, vector<32x128xbf16>
    %cst_9 = arith.constant dense<0.000000e+00> : vector<128x128xf32>
    %8 = tpu.matmul %1, %7, %cst_9 {dimension_numbers = #tpu.dot_dimension_numbers<[1], [0], [0], [1], [0, 0, 1, 1], [], []>} : vector<128x32xbf16>, vector<32x128xbf16>, vector<128x128xf32> -> vector<128x128xf32>
    %c0_10 = arith.constant 0 : index
    %c0_11 = arith.constant 0 : index
    %9 = vector.load %arg6[%c0_10, %c0_11] : memref<1x128xf32, #tpu.memory_space<vmem>>, vector<1x128xf32>
    %10 = vector.broadcast %9 : vector<1x128xf32> to vector<128x128xf32>
    %11 = arith.addf %8, %10 : vector<128x128xf32>
    %c0_12 = arith.constant 0 : index
    %c0_13 = arith.constant 0 : index
    %12 = vector.load %arg7[%c0_12, %c0_13] : memref<32x128xbf16, #tpu.memory_space<vmem>>, vector<32x128xbf16>
    %cst_14 = arith.constant dense<0.000000e+00> : vector<128x128xf32>
    %13 = tpu.matmul %1, %12, %cst_14 {dimension_numbers = #tpu.dot_dimension_numbers<[1], [0], [0], [1], [0, 0, 1, 1], [], []>} : vector<128x32xbf16>, vector<32x128xbf16>, vector<128x128xf32> -> vector<128x128xf32>
    %c0_15 = arith.constant 0 : index
    %c0_16 = arith.constant 0 : index
    %14 = vector.load %arg8[%c0_15, %c0_16] : memref<1x128xf32, #tpu.memory_space<vmem>>, vector<1x128xf32>
    %15 = vector.broadcast %14 : vector<1x128xf32> to vector<128x128xf32>
    %16 = arith.addf %13, %15 : vector<128x128xf32>
    %17 = arith.mulf %6, %6 : vector<128x128xf32>
    %cst_17 = arith.constant dense<0.000000e+00> : vector<128xf32>
    %18 = vector.multi_reduction <add>, %17, %cst_17 [0] : vector<128x128xf32> to vector<128xf32>
    %19 = vector.shape_cast %18 : vector<128xf32> to vector<1x128xf32>
    %20 = arith.mulf %11, %11 : vector<128x128xf32>
    %cst_18 = arith.constant dense<0.000000e+00> : vector<128xf32>
    %21 = vector.multi_reduction <add>, %20, %cst_18 [0] : vector<128x128xf32> to vector<128xf32>
    %22 = vector.shape_cast %21 : vector<128xf32> to vector<1x128xf32>
    %cst_19 = arith.constant dense<0.000000e+00> : vector<128xf32>
    %23 = vector.multi_reduction <add>, %11, %cst_19 [0] : vector<128x128xf32> to vector<128xf32>
    %24 = vector.shape_cast %23 : vector<128xf32> to vector<1x128xf32>
    %cst_20 = arith.constant 0.000000e+00 : f32
    %25 = vector.broadcast %cst_20 : f32 to vector<5x128xf32>
    %26 = tpu.concatenate %19, %22, %24, %25 in 0 : vector<1x128xf32>, vector<1x128xf32>, vector<1x128xf32>, vector<5x128xf32> -> vector<8x128xf32>
    %c0_21 = arith.constant 0 : index
    %c0_22 = arith.constant 0 : index
    %c0_23 = arith.constant 0 : index
    %27 = vector.load %arg10[%c0_21, %c0_22, %c0_23] : memref<1x8x128xf32, #tpu.memory_space<vmem>>, vector<1x8x128xf32>
    %28 = vector.shape_cast %27 : vector<1x8x128xf32> to vector<8x128xf32>
    %29 = vector.shape_cast %26 : vector<8x128xf32> to vector<1x8x128xf32>
    tpu.vector_store %arg10[%c0_21, %c0_22, %c0_23], %29 {strides = array<i32>} : memref<1x8x128xf32, #tpu.memory_space<vmem>>, vector<1x8x128xf32>,
    %30 = arith.truncf %11 : vector<128x128xf32> to vector<128x128xbf16>
    %31 = arith.truncf %16 : vector<128x128xf32> to vector<128x128xbf16>
    %cst_24 = arith.constant dense<0.000000e+00> : vector<128x128xf32>
    %32 = tpu.matmul %30, %31, %cst_24 {dimension_numbers = #tpu.dot_dimension_numbers<[0], [0], [1], [1], [0, 1, 1, 1], [], []>} : vector<128x128xbf16>, vector<128x128xbf16>, vector<128x128xf32> -> vector<128x128xf32>
    %c0_25 = arith.constant 0 : index
    %c0_26 = arith.constant 0 : index
    %c0_27 = arith.constant 0 : index
    %33 = vector.load %arg9[%c0_25, %c0_26, %c0_27] : memref<1x128x128xf32, #tpu.memory_space<vmem>>, vector<1x128x128xf32>
    %34 = vector.shape_cast %33 : vector<1x128x128xf32> to vector<128x128xf32>
    %35 = vector.shape_cast %32 : vector<128x128xf32> to vector<1x128x128xf32>
    tpu.vector_store %arg9[%c0_25, %c0_26, %c0_27], %35 {strides = array<i32>} : memref<1x128x128xf32, #tpu.memory_space<vmem>>, vector<1x128x128xf32>,
    return
  }
  func.func @transform_0(%arg0: i32) -> (i32, i32) {
    %c0_i32 = arith.constant 0 : i32
    %c0_i32_0 = arith.constant 0 : i32
    return %arg0, %c0_i32 : i32, i32
  }
  func.func @transform_1(%arg0: i32) -> (i32, i32) {
    %c0_i32 = arith.constant 0 : i32
    %c0_i32_0 = arith.constant 0 : i32
    return %arg0, %c0_i32 : i32, i32
  }
  func.func @transform_2(%arg0: i32) -> (i32, i32) {
    %c0_i32 = arith.constant 0 : i32
    %c0_i32_0 = arith.constant 0 : i32
    %c0_i32_1 = arith.constant 0 : i32
    return %c0_i32, %c0_i32_0 : i32, i32
  }
  func.func @transform_3(%arg0: i32) -> (i32, i32) {
    %c0_i32 = arith.constant 0 : i32
    %c0_i32_0 = arith.constant 0 : i32
    %c0_i32_1 = arith.constant 0 : i32
    return %c0_i32, %c0_i32_0 : i32, i32
  }
  func.func @transform_4(%arg0: i32) -> (i32, i32) {
    %c0_i32 = arith.constant 0 : i32
    %c0_i32_0 = arith.constant 0 : i32
    %c0_i32_1 = arith.constant 0 : i32
    return %c0_i32, %c0_i32_0 : i32, i32
  }
  func.func @transform_5(%arg0: i32) -> (i32, i32) {
    %c0_i32 = arith.constant 0 : i32
    %c0_i32_0 = arith.constant 0 : i32
    %c0_i32_1 = arith.constant 0 : i32
    return %c0_i32, %c0_i32_0 : i32, i32
  }
  func.func @transform_6(%arg0: i32) -> (i32, i32) {
    %c0_i32 = arith.constant 0 : i32
    %c0_i32_0 = arith.constant 0 : i32
    %c0_i32_1 = arith.constant 0 : i32
    return %c0_i32, %c0_i32_0 : i32, i32
  }
  func.func @transform_7(%arg0: i32) -> (i32, i32) {
    %c0_i32 = arith.constant 0 : i32
    %c0_i32_0 = arith.constant 0 : i32
    %c0_i32_1 = arith.constant 0 : i32
    return %c0_i32, %c0_i32_0 : i32, i32
  }
  func.func @transform_8(%arg0: i32) -> (i32, i32, i32) {
    %c0_i32 = arith.constant 0 : i32
    %c0_i32_0 = arith.constant 0 : i32
    %c0_i32_1 = arith.constant 0 : i32
    return %arg0, %c0_i32, %c0_i32_0 : i32, i32, i32
  }
  func.func @transform_9(%arg0: i32) -> (i32, i32, i32) {
    %c0_i32 = arith.constant 0 : i32
    %c0_i32_0 = arith.constant 0 : i32
    %c0_i32_1 = arith.constant 0 : i32
    return %arg0, %c0_i32, %c0_i32_0 : i32, i32, i32
  }
}

</mosaic_0001>

<bundles_post_ra>
// kernel: tpu_custom_call.1
= control target key start
LH: loop header
LB: loop body
LE: loop exit
PB: predicated region body
PF: predicated region fallthrough
CT: control target
= control target key end

     0   :  { %15 = vsyncpa [#allocation3], 0  ;;  %s1977_s0 = inlined_call_operand.vmem [shape: bf16[256,32], index: 0, kind: input, shape index: {}]   ;;  %s1978_s1 = inlined_call_operand.vmem [shape: bf16[256,32], index: 1, kind: input, shape index: {}]   ;;  %s1979_s2 = inlined_call_operand.vmem [shape: bf16[32,128], index: 2, kind: input, shape index: {}]   ;;  %s1980_s3 = inlined_call_operand.vmem [shape: f32[1,128], index: 3, kind: input, shape index: {}]   ;;  %s1981_s4 = inlined_call_operand.vmem [shape: bf16[32,128], index: 4, kind: input, shape index: {}]   ;;  %s1982_s5 = inlined_call_operand.vmem [shape: f32[1,128], index: 5, kind: input, shape index: {}]   ;;  %s1983_s6 = inlined_call_operand.vmem [shape: bf16[32,128], index: 6, kind: input, shape index: {}]   ;;  %s1984_s7 = inlined_call_operand.vmem [shape: f32[1,128], index: 7, kind: input, shape index: {}]   ;;  %s1985_s8 = inlined_call_operand.hbm [shape: f32[2,128,128], index: 8, kind: output, shape index: {0}]   ;;  %s1986_s9 = inlined_call_operand.hbm [shape: f32[2,8,128], index: 9, kind: output, shape index: {1}]  }
   0x1   :  { %17 = vsyncpa [#allocation3 + $0x1], 0 }
   0x2   :  { %18 = vsyncpa [#allocation5], 0 }
   0x3   :  { %20 = vsyncpa [#allocation5 + $0x1], 0  ;;  %s1696_s30 = smov 0   ;;  %s1698_s10 = smov 0  }
   0x4   :  { %s1700_s11 = smov 0   ;;  %s1702_s12 = smov 0  }
   0x5 LB: > { %s1717_s13 = sadd.s32 4294967295, %s1640_s12   ;;  %s1273_s14 = sadd.s32 4294967294, %s1640_s12   ;;  %s1640_s12 = sphi %s1702_s12, %s1992_s12   ;;  %s1636_s11 = sphi %s1700_s11, %s1991_s11   ;;  %s1632_s10 = sphi %s1698_s10, %s1990_s10   ;;  %s1628_s30 = sphi %s1696_s30, %s1989_s30  }
   0x6   : > { %s1721_s15 = sadd.s32 1, %s1640_s12   ;;  %s211_s16 = sadd.s32 1, %s1636_s11 }
   0x7   : > { %s208_s17 = ssub.s32 %s1640_s12, %s1721_s15  ;;  %p221_p0 = scmp.ne.s32.totalorder %s1636_s11, %s1632_s10 }
   0x8   : > { %p209_p1 = scmp.eq.s32.totalorder %s208_s17, 0  ;;  %p222_p2 = scmp.eq.s32.totalorder %s1717_s13, 1 }
   0x9   : > { %p227_p3 = scmp.ne.s32.totalorder %s1632_s10, %s1628_s30  ;;  %p228_p4 = scmp.eq.s32.totalorder %s1273_s14, 1 }
   0xa   : > { %s1732_s18 = scalar_select %p209_p1, %s1636_s11, %s211_s16  }
   0xb   : > { %p1734_p5 = por %p222_p2, %p221_p0  ;;  %p1738_p6 = por %p228_p4, %p227_p3 }
   0xc   : > { %p1276_p7 = scmp.ge.s32.totalorder %s1640_s12, 1  ;;  %p308_p8 = scmp.lt.s32.totalorder %s1640_s12, 3 }
   0xe   : > { %p309_p9 = pnand %p1276_p7, %p308_p8 }
   0xf   : > { %v1524_v0 = vld [vmem:[%s1979_s2] sm:$0xff] (!%p309_p9)   ;;  %s1279_s23 = sshll.u32 (!%p309_p9), %s1717_s13, 4  ;;  %v1526_v2 = vld [vmem:[%s1979_s2 + $0x8] sm:$0xff] (!%p309_p9)   ;;  %vm462_vm0 = vcmask (!%p309_p9), 261120   ;;  %vm983_vm1 = vcmask (!%p309_p9), 1040384   ;;  %vm985_vm2 = vcmask (!%p309_p9), 1041408  }
  0x10   : > { %312 = sbr.rel (%p309_p9) target bundleno = 609 (0x261), region = 52  ;;  %v1525_v1 = vld [vmem:[%s1981_s4] sm:$0xff] (!%p309_p9)   ;;  %p355_p10 = scmp.lt.s32.totalorder (!%p309_p9), %s1279_s23, 31  ;;  %1386 = vmatprep.subr.bf16.mxu0 (!%p309_p9), %v1524_v0  ;;  %v1527_v3 = vld [vmem:[%s1981_s4 + $0x8] sm:$0xff] (!%p309_p9)   ;;  %vm987_vm3 = vcmask (!%p309_p9), 1042432  }
  0x11   : > { %1406 = vmatprep.subr.bf16.mxu1 (!%p309_p9), %v1525_v1  ;;  %1387 = vmatpush3.bf16.msra.mxu0 (!%p309_p9), %v1524_v0  ;;  %v1544_v4 = vld [vmem:[%s1983_s6] sm:$0xff] (!%p309_p9)   ;;  %v1545_v6 = vld [vmem:[%s1983_s6 + $0x8] sm:$0xff] (!%p309_p9)   ;;  %s1642_s21 = smov (!%p309_p9), [#allocation4]  }
  0x12   : > { %1407 = vmatpush3.bf16.msra.mxu1 (!%p309_p9), %v1525_v1  ;;  %1388 = vmatprep.subr.bf16.mxu0 (!%p309_p9), %v1526_v2  ;;  %v1816_v22 = vld [vmem:[%s1980_s3] ss:$0 sm:$0xff] (!%p309_p9)  ;;  %s1550_s22 = sshll.u32 (!%p309_p9), %s1642_s21, 4  ;;  %s1551_s22 = int_to_ptr.vmem [resolvable:$false] %s1550_s22 }
  0x13   : > { %1408 = vmatprep.subr.bf16.mxu1 (!%p309_p9), %v1527_v3  ;;  %v1821_v24 = vld [vmem:[%s1982_s5] ss:$0 sm:$0xff] (!%p309_p9) }
  0x15   : > { %1389 = vmatpush3.bf16.msra.mxu0 (!%p309_p9), %v1526_v2 }
  0x16   : > { %1409 = vmatpush3.bf16.msra.mxu1 (!%p309_p9), %v1527_v3  ;;  %1426 = vmatprep.subr.bf16.mxu0 (!%p309_p9), %v1544_v4 }
  0x17   : > { %s1994_s23 = smov (!%p355_p10, %s1279_s23), 31 }
  0x18   : > { %s1280_s17 = sshll.u32 %s1994_s23, 2 }
  0x19   : > { %s1763_s24 = scalar_lea.vmem %s1977_s0, %s1280_s17  ;;  %s1768_s27 = scalar_lea.vmem %s1978_s1, %s1280_s17 }
  0x1a   : > { %v1528_v5 = vld [vmem:[%s1763_s24] sm:$0xff]   ;;  %v1530_v8 = vld [vmem:[%s1763_s24 + $0x8] sm:$0xff]   ;;  %v1532_v10 = vld [vmem:[%s1763_s24 + $0x10] sm:$0xff]  }
  0x1b   : > { %v1529_v7 = vld [vmem:[%s1768_s27] sm:$0xff]   ;;  %1390 = vmatprep.mubr.msk.bf16.mxu0 %vm462_vm0, %v1528_v5  ;;  %v1531_v9 = vld [vmem:[%s1768_s27 + $0x8] sm:$0xff]   ;;  %v1533_v11 = vld [vmem:[%s1768_s27 + $0x10] sm:$0xff]  }
  0x1c   : > { %1410 = vmatprep.mubr.msk.bf16.mxu1 %vm462_vm0, %v1529_v7  ;;  %1391 = vmatmul.mubr.msk.bf16.vlgmr.msra.gmra.mrb[0].mxu0 %vm462_vm0, %v1530_v8  ;;  %v1534_v12 = vld [vmem:[%s1763_s24 + $0x18] sm:$0xff]   ;;  %v1536_v14 = vld [vmem:[%s1763_s24 + $0x20] sm:$0xff]   ;;  %v1538_v16 = vld [vmem:[%s1763_s24 + $0x28] sm:$0xff]  }
  0x1d   : > { %1411 = vmatmul.mubr.msk.bf16.vlgmr.msra.gmra.mrb[0].mxu1 %vm462_vm0, %v1531_v9  ;;  %1427 = vmatpush3.bf16.msra.mxu0 %v1544_v4  ;;  %v1535_v13 = vld [vmem:[%s1768_s27 + $0x18] sm:$0xff]   ;;  %v1537_v15 = vld [vmem:[%s1768_s27 + $0x20] sm:$0xff]   ;;  %v1539_v17 = vld [vmem:[%s1768_s27 + $0x28] sm:$0xff]  }
  0x1e   : > { %1394 = vmatprep.mubr.msk.bf16.mxu0 %vm462_vm0, %v1532_v10  ;;  %1428 = vmatprep.subr.bf16.mxu0 %v1545_v6  ;;  %v1540_v18 = vld [vmem:[%s1763_s24 + $0x30] sm:$0xff]   ;;  %v1542_v20 = vld [vmem:[%s1763_s24 + $0x38] sm:$0xff]   ;;  %s1869_s24 = sand.u32 1, %s1632_s10  }
  0x1f   : > { %1414 = vmatprep.mubr.msk.bf16.mxu1 %vm462_vm0, %v1533_v11  ;;  %v1541_v19 = vld [vmem:[%s1768_s27 + $0x30] sm:$0xff]   ;;  %v1543_v21 = vld [vmem:[%s1768_s27 + $0x38] sm:$0xff]   ;;  %s1278_s25 = sshll.u32 %s1869_s24, 3  ;;  %s1336_s27 = sshll.u32 %s1717_s13, 7 }
  0x20   : > { %s1876_s26 = scalar_lea.vmem [#allocation4], %s1278_s25  ;;  %s1887_s29 = scalar_lea.hbm %s1986_s9, %s1336_s27 }
  0x21   : > { %1429 = vmatpush3.bf16.msra.mxu0 %v1545_v6  ;;  %s1170_s14 = sshll.u32 %s1876_s26, 4  ;;  %s1141_s16 = scalar_lea.sflag [#allocation5], %s1869_s24  ;;  %s1171_s14 = int_to_ptr.vmem [resolvable:$true] %s1170_s14 }
  0x22   : > { %s1546_s17 = scalar_lea.vmem %s1171_s14, 128  ;;  %s1552_s25 = scalar_lea.vmem %s1551_s22, 256 }
  0x23   : > { %p1547_p11 = scmp.ne.s32.totalorder %s1171_s14, %s1546_s17  ;;  %p1553_p0 = scmp.lt.s32.totalorder %s1171_s14, %s1551_s22 }
  0x24   : > { %1395 = vmatmul.mubr.msk.bf16.gmra.mrb[4].mxu0 %vm462_vm0, %v1534_v12  ;;  %p1554_p1 = scmp.lt.s32.totalorder %s1552_s25, %s1546_s17 }
  0x25   : > { %1415 = vmatmul.mubr.msk.bf16.gmra.mrb[4].mxu1 %vm462_vm0, %v1535_v13  ;;  %1398 = vmatprep.mubr.msk.bf16.mxu0 %vm462_vm0, %v1536_v14  ;;  %p1548_p12 = pnand %p1547_p11, %p1734_p5 }
  0x26   : > { %1418 = vmatprep.mubr.msk.bf16.mxu1 %vm462_vm0, %v1537_v15  ;;  %p1555_p2 = por %p1554_p1, %p1553_p0 }
  0x27   : > { %p1549_p13 = pneg %p1548_p12 }
  0x29   : > { %p1556_p3 = pnand %p1555_p2, %p1549_p13 }
  0x2c   : > { %1399 = vmatmul.mubr.msk.bf16.gmra.mrb[8].mxu0 %vm462_vm0, %v1538_v16 }
  0x2d   : > { %1419 = vmatmul.mubr.msk.bf16.gmra.mrb[8].mxu1 %vm462_vm0, %v1539_v17  ;;  %1402 = vmatprep.mubr.msk.bf16.mxu0 %vm462_vm0, %v1540_v18 }
  0x2e   : > { %1422 = vmatprep.mubr.msk.bf16.mxu1 %vm462_vm0, %v1541_v19 }
  0x34   : > { %1403 = vmatmul.mubr.msk.bf16.gmra.mrb[12].mxu0 %vm462_vm0, %v1542_v20 }
  0x35   : > { %1423 = vmatmul.mubr.msk.bf16.gmra.mrb[12].mxu1 %vm462_vm0, %v1543_v21  ;;  %1430 = vmatprep.mubr.msk.bf16.mxu0 %vm462_vm0, %v1529_v7 }
  0x3c   : > { %1431 = vmatmul.mubr.msk.bf16.vlgmr.msra.gmra.mrb[16].mxu0 %vm462_vm0, %v1531_v9 }
  0x3d   : > { %1434 = vmatprep.mubr.msk.bf16.mxu0 %vm462_vm0, %v1533_v11 }
  0x44   : > { %1435 = vmatmul.mubr.msk.bf16.gmra.mrb[20].mxu0 %vm462_vm0, %v1535_v13 }
  0x45   : > { %1438 = vmatprep.mubr.msk.bf16.mxu0 %vm462_vm0, %v1537_v15 }
  0x4c   : > { %1439 = vmatmul.mubr.msk.bf16.gmra.mrb[24].mxu0 %vm462_vm0, %v1539_v17 }
  0x4d   : > { %1442 = vmatprep.mubr.msk.bf16.mxu0 %vm462_vm0, %v1541_v19 }
  0x54   : > { %1443 = vmatmul.mubr.msk.bf16.gmra.mrb[28].mxu0 %vm462_vm0, %v1543_v21 }
  0xef   : > { %v1392_v23 = vpop.f32.mrb[0].mxu0 }
  0xf0   : > { %v1412_v25 = vpop.f32.mrb[0].mxu1  ;;  %v521_v26 = vpop.f32.mrb[1].mxu0  ;;  %v530_v27 = vadd.f32 %v1392_v23, %v1816_v22 }
  0xf1   : > { %v522_v28 = vadd.f32 %v1816_v22, %v521_v26  ;;  %v705_v29 = vpop.f32.mrb[1].mxu1  ;;  %v1393_v30 = vpop.f32.mrb[2].mxu0  ;;  %v714_v31 = vadd.f32 %v1412_v25, %v1821_v24 }
  0xf2   : > { %v706_v32 = vadd.f32 %v1821_v24, %v705_v29  ;;  %v1413_v33 = vpop.f32.mrb[2].mxu1  ;;  %v524_v34 = vpop.f32.mrb[3].mxu0  ;;  %v533_v36 = vadd.f32 %v1393_v30, %v1816_v22  ;;  %v890_v41 = vmul.f32 %v530_v27, %v530_v27 }
  0xf3   : > { %v888_v35 = vmul.f32 %v522_v28, %v522_v28  ;;  %v717_v37 = vadd.f32 %v1413_v33, %v1821_v24  ;;  %v525_v38 = vadd.f32 %v1816_v22, %v524_v34  ;;  %v708_v39 = vpop.f32.mrb[3].mxu1  ;;  %v927_v51 = vmul.f32 %v714_v31, %v714_v31 }
  0xf4   : > { %v709_v40 = vadd.f32 %v1821_v24, %v708_v39  ;;  %v925_v44 = vmul.f32 %v706_v32, %v706_v32  ;;  %v891_v48 = vmul.f32 %v533_v36, %v533_v36 }
  0xf5   : > { %v889_v42 = vmul.f32 %v525_v38, %v525_v38  ;;  %v991_v43 = vpack.c.bf16 %v717_v37, %v714_v31  ;;  %v928_v56 = vmul.f32 %v717_v37, %v717_v37 }
  0xf6   : > { %v926_v45 = vmul.f32 %v709_v40, %v709_v40  ;;  %v962_v46 = vadd.f32 %v709_v40, %v706_v32  ;;  %v990_v47 = vpack.c.bf16 %v709_v40, %v706_v32 }
  0xf7   : > { %v904_v49 = vadd.f32 %v889_v42, %v888_v35  ;;  %v1396_v50 = vpop.f32.mrb[4].mxu0 }
  0xf8   : > { %v941_v52 = vadd.f32 %v926_v45, %v925_v44  ;;  %v963_v53 = vadd.f32 %v962_v46, %v714_v31  ;;  %v1416_v54 = vpop.f32.mrb[4].mxu1  ;;  %1006 = vxpose.xlu0.c.b16.start [1/8] %v990_v47, 128  ;;  %v537_v55 = vpop.f32.mrb[5].mxu0  ;;  %v546_v62 = vadd.f32 %v1396_v50, %v1816_v22 }
  0xf9   : > { %v905_v57 = vadd.f32 %v904_v49, %v890_v41  ;;  %v538_v58 = vadd.f32 %v1816_v22, %v537_v55  ;;  %v721_v59 = vpop.f32.mrb[5].mxu1  ;;  %v1397_v60 = vpop.f32.mrb[6].mxu0  ;;  %v730_v3 = vadd.f32 %v1416_v54, %v1821_v24 }
  0xfa   : > { %v942_v61 = vadd.f32 %v941_v52, %v927_v51  ;;  %v722_v63 = vadd.f32 %v1821_v24, %v721_v59  ;;  %v964_v0 = vadd.f32 %v963_v53, %v717_v37  ;;  %v1417_v1 = vpop.f32.mrb[6].mxu1  ;;  %v540_v2 = vpop.f32.mrb[7].mxu0  ;;  %v549_v12 = vadd.f32 %v1397_v60, %v1816_v22 }
  0xfb   : > { %v892_v4 = vmul.f32 %v538_v58, %v538_v58  ;;  %v906_v5 = vadd.f32 %v905_v57, %v891_v48  ;;  %v724_v6 = vpop.f32.mrb[7].mxu1  ;;  %v733_v10 = vadd.f32 %v1417_v1, %v1821_v24  ;;  %v541_v13 = vadd.f32 %v1816_v22, %v540_v2 }
  0xfc   : > { %v929_v7 = vmul.f32 %v722_v63, %v722_v63  ;;  %v943_v8 = vadd.f32 %v942_v61, %v928_v56  ;;  %v965_v9 = vadd.f32 %v964_v0, %v722_v63  ;;  %1007 = vxpose.xlu0.c.b16.cont [2/8] %v991_v43, 128  ;;  %v725_v14 = vadd.f32 %v1821_v24, %v724_v6 }
  0xfd   : > { %v907_v11 = vadd.f32 %v906_v5, %v892_v4  ;;  %v894_v15 = vmul.f32 %v546_v62, %v546_v62  ;;  %v993_v17 = vpack.c.bf16 %v733_v10, %v730_v3  ;;  %v893_v18 = vmul.f32 %v541_v13, %v541_v13 }
  0xfe   : > { %v944_v16 = vadd.f32 %v943_v8, %v929_v7  ;;  %v930_v19 = vmul.f32 %v725_v14, %v725_v14  ;;  %v966_v20 = vadd.f32 %v965_v9, %v725_v14  ;;  %v992_v23 = vpack.c.bf16 %v725_v14, %v722_v63 }
  0xff   : > { %v1400_v21 = vpop.f32.mrb[8].mxu0  ;;  %v931_v25 = vmul.f32 %v730_v3, %v730_v3  ;;  %v895_v28 = vmul.f32 %v549_v12, %v549_v12  ;;  %v908_v29 = vadd.f32 %v907_v11, %v893_v18  ;;  %v932_v34 = vmul.f32 %v733_v10, %v733_v10 }
 0x100   : > { %v1420_v26 = vpop.f32.mrb[8].mxu1  ;;  %v553_v27 = vpop.f32.mrb[9].mxu0  ;;  %v945_v30 = vadd.f32 %v944_v16, %v930_v19  ;;  %v967_v31 = vadd.f32 %v966_v20, %v730_v3  ;;  %1008 = vxpose.xlu0.c.b16.cont [3/8] %v992_v23, 128  ;;  %v562_v35 = vadd.f32 %v1400_v21, %v1816_v22 }
 0x101   : > { %v737_v32 = vpop.f32.mrb[9].mxu1  ;;  %v1401_v33 = vpop.f32.mrb[10].mxu0  ;;  %v554_v36 = vadd.f32 %v1816_v22, %v553_v27  ;;  %v909_v40 = vadd.f32 %v908_v29, %v894_v15  ;;  %v746_v42 = vadd.f32 %v1420_v26, %v1821_v24 }
 0x102   : > { %v738_v37 = vadd.f32 %v1821_v24, %v737_v32  ;;  %v1421_v38 = vpop.f32.mrb[10].mxu1  ;;  %v556_v39 = vpop.f32.mrb[11].mxu0  ;;  %v946_v41 = vadd.f32 %v945_v30, %v931_v25  ;;  %v968_v43 = vadd.f32 %v967_v31, %v733_v10  ;;  %v565_v47 = vadd.f32 %v1401_v33, %v1816_v22  ;;  %v1858_v32 = vld [vmem:[%s1984_s7] ss:$0 sm:$0xff] }
 0x103   : > { %v740_v44 = vpop.f32.mrb[11].mxu1  ;;  %v896_v45 = vmul.f32 %v554_v36, %v554_v36  ;;  %v749_v48 = vadd.f32 %v1421_v38, %v1821_v24  ;;  %v910_v49 = vadd.f32 %v909_v40, %v895_v28  ;;  %v557_v52 = vadd.f32 %v1816_v22, %v556_v39 }
 0x104   : > { %v933_v46 = vmul.f32 %v738_v37, %v738_v37  ;;  %v947_v50 = vadd.f32 %v946_v41, %v932_v34  ;;  %v969_v51 = vadd.f32 %v968_v43, %v738_v37  ;;  %1009 = vxpose.xlu0.c.b16.cont [4/8] %v993_v17, 128  ;;  %v741_v53 = vadd.f32 %v1821_v24, %v740_v44 }
 0x105   : > { %v995_v54 = vpack.c.bf16 %v749_v48, %v746_v42  ;;  %v898_v55 = vmul.f32 %v562_v35, %v562_v35  ;;  %v911_v56 = vadd.f32 %v910_v49, %v896_v45  ;;  %v897_v58 = vmul.f32 %v557_v52, %v557_v52 }
 0x106   : > { %v948_v57 = vadd.f32 %v947_v50, %v933_v46  ;;  %v934_v60 = vmul.f32 %v741_v53, %v741_v53  ;;  %v970_v61 = vadd.f32 %v969_v51, %v741_v53  ;;  %v994_v63 = vpack.c.bf16 %v741_v53, %v738_v37 }
 0x107   : > { %v1404_v59 = vpop.f32.mrb[12].mxu0  ;;  %v935_v1 = vmul.f32 %v746_v42, %v746_v42  ;;  %v899_v2 = vmul.f32 %v565_v47, %v565_v47  ;;  %v912_v3 = vadd.f32 %v911_v56, %v897_v58  ;;  %v936_v13 = vmul.f32 %v749_v48, %v749_v48 }
 0x108   : > { %v1424_v62 = vpop.f32.mrb[12].mxu1  ;;  %v569_v0 = vpop.f32.mrb[13].mxu0  ;;  %v949_v7 = vadd.f32 %v948_v57, %v934_v60  ;;  %v971_v8 = vadd.f32 %v970_v61, %v746_v42  ;;  %v578_v9 = vadd.f32 %v1404_v59, %v1816_v22  ;;  %1010 = vxpose.xlu0.c.b16.cont [5/8] %v994_v63, 128 }
 0x109   : > { %v570_v4 = vadd.f32 %v1816_v22, %v569_v0  ;;  %v753_v5 = vpop.f32.mrb[13].mxu1  ;;  %v1405_v6 = vpop.f32.mrb[14].mxu0  ;;  %v913_v14 = vadd.f32 %v912_v3, %v898_v55  ;;  %v762_v15 = vadd.f32 %v1424_v62, %v1821_v24 }
 0x10a   : > { %v754_v10 = vadd.f32 %v1821_v24, %v753_v5  ;;  %v1425_v11 = vpop.f32.mrb[14].mxu1  ;;  %v572_v12 = vpop.f32.mrb[15].mxu0  ;;  %v950_v18 = vadd.f32 %v949_v7, %v935_v1  ;;  %v972_v20 = vadd.f32 %v971_v8, %v749_v48  ;;  %v581_v25 = vadd.f32 %v1405_v6, %v1816_v22 }
 0x10b   : > { %v900_v16 = vmul.f32 %v570_v4, %v570_v4  ;;  %v756_v17 = vpop.f32.mrb[15].mxu1  ;;  %v765_v21 = vadd.f32 %v1425_v11, %v1821_v24  ;;  %v914_v23 = vadd.f32 %v913_v14, %v899_v2  ;;  %v573_v26 = vadd.f32 %v1816_v22, %v572_v12 }
 0x10c   : > { %v937_v19 = vmul.f32 %v754_v10, %v754_v10  ;;  %v757_v27 = vadd.f32 %v1821_v24, %v756_v17  ;;  %v902_v28 = vmul.f32 %v578_v9, %v578_v9  ;;  %v951_v29 = vadd.f32 %v950_v18, %v936_v13  ;;  %1011 = vxpose.xlu0.c.b16.cont [6/8] %v995_v54, 128 }
 0x10d   : > { %v973_v30 = vadd.f32 %v972_v20, %v754_v10  ;;  %v997_v31 = vpack.c.bf16 %v765_v21, %v762_v15  ;;  %v915_v33 = vadd.f32 %v914_v23, %v900_v16  ;;  %v901_v34 = vmul.f32 %v573_v26, %v573_v26 }
 0x10e   : > { %v938_v35 = vmul.f32 %v757_v27, %v757_v27  ;;  %v996_v36 = vpack.c.bf16 %v757_v27, %v754_v10  ;;  %v952_v38 = vadd.f32 %v951_v29, %v937_v19  ;;  %v903_v40 = vmul.f32 %v581_v25, %v581_v25 }
 0x10f   : > { %v1432_v37 = vpop.f32.mrb[16].mxu0  ;;  %v974_v39 = vadd.f32 %v973_v30, %v757_v27  ;;  %v916_v41 = vadd.f32 %v915_v33, %v901_v34  ;;  %v939_v44 = vmul.f32 %v762_v15, %v762_v15  ;;  %v940_v51 = vmul.f32 %v765_v21, %v765_v21 }
 0x110   : > { %v834_v22 = vadd.f32 %v1432_v37, %v1858_v32  ;;  %v825_v24 = vpop.f32.mrb[17].mxu0  ;;  %v953_v45 = vadd.f32 %v952_v38, %v938_v35  ;;  %1012 = vxpose.xlu0.c.b16.cont [7/8] %v996_v36, 128 }
 0x111   : > { %v826_v42 = vadd.f32 %v1858_v32, %v825_v24  ;;  %v1433_v43 = vpop.f32.mrb[18].mxu0  ;;  %v975_v46 = vadd.f32 %v974_v39, %v762_v15  ;;  %v917_v49 = vadd.f32 %v916_v41, %v902_v28 }
 0x112   : > { %v837_v47 = vadd.f32 %v1433_v43, %v1858_v32  ;;  %v828_v48 = vpop.f32.mrb[19].mxu0  ;;  %v954_v52 = vadd.f32 %v953_v45, %v939_v44 }
 0x113   : > { %v829_v50 = vadd.f32 %v1858_v32, %v828_v48  ;;  %v976_v53 = vadd.f32 %v975_v46, %v765_v21  ;;  %v918_v55 = vadd.f32 %v917_v49, %v903_v40 }
 0x114   : > { %v999_v54 = vpack.c.bf16 %v837_v47, %v834_v22  ;;  %v955_v57 = vadd.f32 %v954_v52, %v940_v51  ;;  %1013 = vxpose.xlu0.c.b16.end [8/8] %v997_v31, 128 }
 0x115   : > { %v998_v56 = vpack.c.bf16 %v829_v50, %v826_v42  ;;  %v977_v58 = vrot.slane %v976_v53, 4  ;;  %v919_v59 = vrot.slane %v918_v55, 4 }
 0x116   : > { %v956_v61 = vrot.slane %v955_v57, 4 }
 0x117   : > { %v1436_v60 = vpop.f32.mrb[20].mxu0  ;;  %1446 = vmatprep.subr.bf16.mxu1 %v998_v56  ;;  %v978_v62 = vadd.f32 %v977_v58, %v976_v53  ;;  %v920_v1 = vadd.f32 %v919_v59, %v918_v55 }
 0x118   : > { %v850_v63 = vadd.f32 %v1436_v60, %v1858_v32  ;;  %v841_v0 = vpop.f32.mrb[21].mxu0  ;;  %1447 = vmatpush3.bf16.msra.mxu1 %v998_v56  ;;  %v957_v4 = vadd.f32 %v956_v61, %v955_v57 }
 0x119   : > { %v842_v2 = vadd.f32 %v1858_v32, %v841_v0  ;;  %v1437_v3 = vpop.f32.mrb[22].mxu0  ;;  %1448 = vmatprep.subr.bf16.mxu1 %v999_v54  ;;  %v979_v5 = vrot.slane %v978_v62, 2  ;;  %v921_v8 = vrot.slane %v920_v1, 2 }
 0x11a   : > { %v853_v6 = vadd.f32 %v1437_v3, %v1858_v32  ;;  %v844_v7 = vpop.f32.mrb[23].mxu0  ;;  %v958_v10 = vrot.slane %v957_v4, 2 }
 0x11b   : > { %v845_v9 = vadd.f32 %v1858_v32, %v844_v7  ;;  %v980_v12 = vadd.f32 %v979_v5, %v978_v62  ;;  %v922_v13 = vadd.f32 %v921_v8, %v920_v1 }
 0x11c   : > { %v1001_v11 = vpack.c.bf16 %v853_v6, %v850_v63  ;;  %1449 = vmatpush3.bf16.msra.mxu1 %v999_v54  ;;  %v959_v15 = vadd.f32 %v958_v10, %v957_v4 }
 0x11d   : > { %v1000_v14 = vpack.c.bf16 %v845_v9, %v842_v2  ;;  %v923_v16 = vrot.slane %v922_v13, 1  ;;  %v981_v18 = vrot.slane %v980_v12, 1 }
 0x11e   : > { %v960_v21 = vrot.slane %v959_v15, 1 }
 0x11f   : > { %v1440_v17 = vpop.f32.mrb[24].mxu0  ;;  %1450 = vmatprep.subr.bf16.mxu1 %v1000_v14  ;;  %v924_v26 = vadd.f32 %v923_v16, %v922_v13  ;;  %v982_v31 = vadd.f32 %v981_v18, %v980_v12 }
 0x120   : > { %v866_v19 = vadd.f32 %v1440_v17, %v1858_v32  ;;  %v857_v20 = vpop.f32.mrb[25].mxu0  ;;  %1451 = vmatpush3.bf16.msra.mxu1 %v1000_v14  ;;  %v961_v29 = vadd.f32 %v960_v21, %v959_v15 }
 0x121   : > { %v858_v23 = vadd.f32 %v1858_v32, %v857_v20  ;;  %v1441_v25 = vpop.f32.mrb[26].mxu0  ;;  %1452 = vmatprep.subr.bf16.mxu1 %v1001_v11 }
 0x122   : > { %v869_v27 = vadd.f32 %v1441_v25, %v1858_v32  ;;  %v860_v28 = vpop.f32.mrb[27].mxu0  ;;  %v984_v34 = vsel %vm983_vm1, %v924_v26, %v961_v29 }
 0x123   : > { %v861_v30 = vadd.f32 %v1858_v32, %v860_v28  ;;  %v986_v36 = vsel %vm985_vm2, %v984_v34, %v982_v31 }
 0x124   : > { %v1003_v33 = vpack.c.bf16 %v869_v27, %v866_v19  ;;  %1453 = vmatpush3.bf16.msra.mxu1 %v1001_v11  ;;  %v988_v37 = vsel %vm987_vm3, %v986_v36, 0.0 }
 0x125   : > { %v1002_v35 = vpack.c.bf16 %v861_v30, %v858_v23  ;;  %989 = vst [vmem:[%s1876_s26] sm:$0xff] %v988_v37 }
 0x127   : > { %v1444_v38 = vpop.f32.mrb[28].mxu0  ;;  %1454 = vmatprep.subr.bf16.mxu1 %v1002_v35 }
 0x128   : > { %v882_v39 = vadd.f32 %v1444_v38, %v1858_v32  ;;  %v873_v22 = vpop.f32.mrb[29].mxu0  ;;  %1455 = vmatpush3.bf16.msra.mxu1 %v1002_v35 }
 0x129   : > { %v874_v24 = vadd.f32 %v1858_v32, %v873_v22  ;;  %v1445_v40 = vpop.f32.mrb[30].mxu0  ;;  %1456 = vmatprep.subr.bf16.mxu1 %v1003_v33 }
 0x12a   : > { %v885_v41 = vadd.f32 %v1445_v40, %v1858_v32  ;;  %v876_v42 = vpop.f32.mrb[31].mxu0 }
 0x12b   : > { %v877_v43 = vadd.f32 %v1858_v32, %v876_v42 }
 0x12c   : > { %v1005_v44 = vpack.c.bf16 %v885_v41, %v882_v39  ;;  %1457 = vmatpush3.bf16.msra.mxu1 %v1003_v33 }
 0x12d   : > { %v1004_v45 = vpack.c.bf16 %v877_v43, %v874_v24 }
 0x12f   : > { %1458 = vmatprep.subr.bf16.mxu1 %v1004_v45 }
 0x130   : > { %1459 = vmatpush3.bf16.msra.mxu1 %v1004_v45 }
 0x131   : > { %1460 = vmatprep.subr.bf16.mxu1 %v1005_v44 }
 0x134   : > { %1461 = vmatpush3.bf16.msra.mxu1 %v1005_v44 }
 0x15e   : > { %v1014_v46 = vpop.trf.xlu0 }
 0x15f   : > { %1462 = vmatprep.mubr.bf16.mxu1 %v1014_v46 }
 0x162   : > { %v1015_v47 = vpop.trf.xlu0 }
 0x163   : > { %1463 = vmatmul.mubr.bf16.vlgmr.msra.gmra.mrb[16].mxu1 %v1015_v47 }
 0x166   : > { %v1016_v48 = vpop.trf.xlu0 }
 0x167   : > { %1466 = vmatprep.mubr.bf16.mxu1 %v1016_v48 }
 0x16a   : > { %v1017_v49 = vpop.trf.xlu0 }
 0x16b   : > { %1467 = vmatmul.mubr.bf16.gmra.mrb[20].mxu1 %v1017_v49 }
 0x16e   : > { %v1018_v32 = vpop.trf.xlu0 }
 0x16f   : > { %1470 = vmatprep.mubr.bf16.mxu1 %v1018_v32 }
 0x172   : > { %v1019_v50 = vpop.trf.xlu0 }
 0x173   : > { %1471 = vmatmul.mubr.bf16.gmra.mrb[24].mxu1 %v1019_v50 }
 0x176   : > { %v1020_v51 = vpop.trf.xlu0 }
 0x177   : > { %1474 = vmatprep.mubr.bf16.mxu1 %v1020_v51 }
 0x17a   : > { %v1021_v52 = vpop.trf.xlu0 }
 0x17b   : > { %1475 = vmatmul.mubr.bf16.gmra.mrb[28].mxu1 %v1021_v52 }
 0x17c   : > { %1559 = shalt.err (!%p1556_p3)
}
 0x17d   : > { %s1560_s26 = scalar_lea.hbm %s1887_s29, 128  ;;  %s1564_s28 = scalar_lea.hbm %s1986_s9, 256 }
 0x17e   : > { %p1561_p4 = scmp.ne.s32.totalorder %s1887_s29, %s1560_s26  ;;  %p1565_p9 = scmp.lt.u32.totalorder %s1887_s29, %s1986_s9 }
 0x17f   : > { %p1566_p10 = scmp.lt.u32.totalorder %s1564_s28, %s1560_s26  ;;  %p1568_p12 = scmp.lt.u32.totalorder %s1560_s26, %s1887_s29 }
 0x180   : > { %p1562_p7 = pnand %p1561_p4, %p1734_p5 }
 0x181   : > { %p1567_p11 = por %p1566_p10, %p1565_p9 }
 0x182   : > { %p1563_p8 = pneg %p1562_p7 }
 0x183   : > { %p1569_p13 = por %p1568_p12, %p1567_p11 }
 0x185   : > { %p1570_p0 = pnand %p1569_p13, %p1563_p8 }
 0x187   : > { %1573 = shalt.err (!%p1570_p0)
}
 0x188   : > { %1479 = dma.vmem_to_hbm [thread:$0]  (%p1734_p5), %s1171_s14, 128, %s1887_s29, %s1141_s16  }
 0x189   : > { %s1277_s17 = sshll.u32 %s1869_s24, 7  ;;  %s1339_s29 = sshll.u32 %s1717_s13, 11 }
 0x18a   : > { %s1909_s25 = scalar_lea.vmem [#allocation2], %s1277_s17  ;;  %s1929_s27 = scalar_lea.hbm %s1985_s8, %s1339_s29 }
 0x18b   : > { %s1154_s14 = sshll.u32 %s1909_s25, 4  ;;  %s1136_s13 = scalar_lea.sflag [#allocation3], %s1869_s24  ;;  %s1931_s14 = int_to_ptr.vmem [resolvable:$true] %s1154_s14 }
 0x18c   : > { %s1574_s23 = scalar_lea.vmem %s1931_s14, 2048  ;;  %s1643_s28 = smov [#allocation2]  }
 0x18d   : > { %p1575_p1 = scmp.ne.s32.totalorder %s1931_s14, %s1574_s23  ;;  %s1578_s21 = sshll.u32 %s1643_s28, 4  ;;  %s1579_s21 = int_to_ptr.vmem [resolvable:$false] %s1578_s21 }
 0x18e   : > { %s1580_s22 = scalar_lea.vmem %s1579_s21, 4096  ;;  %p1581_p4 = scmp.lt.s32.totalorder %s1931_s14, %s1579_s21 }
 0x18f   : > { %p1576_p2 = pnand %p1575_p1, %p1734_p5  ;;  %p1582_p7 = scmp.lt.s32.totalorder %s1580_s22, %s1574_s23 }
 0x191   : > { %p1577_p3 = pneg %p1576_p2  ;;  %p1583_p8 = por %p1582_p7, %p1581_p4 }
 0x193   : > { %p1584_p9 = pnand %p1583_p8, %p1577_p3 }
 0x236   : > { %v1464_v53 = vpop.f32.mrb[16].mxu1 }
 0x237   : > { %1121 = vst [vmem:[%s1909_s25 + $0x10] sm:$0xff] %v1464_v53  ;;  %v1056_v54 = vpop.f32.mrb[17].mxu1 }
 0x238   : > { %1119 = vst [vmem:[%s1909_s25] sm:$0xff] %v1056_v54  ;;  %v1465_v55 = vpop.f32.mrb[18].mxu1 }
 0x239   : > { %1122 = vst [vmem:[%s1909_s25 + $0x18] sm:$0xff] %v1465_v55  ;;  %v1059_v56 = vpop.f32.mrb[19].mxu1 }
 0x23a   : > { %1120 = vst [vmem:[%s1909_s25 + $0x8] sm:$0xff] %v1059_v56 }
 0x23e   : > { %v1468_v57 = vpop.f32.mrb[20].mxu1 }
 0x23f   : > { %1125 = vst [vmem:[%s1909_s25 + $0x30] sm:$0xff] %v1468_v57  ;;  %v1072_v58 = vpop.f32.mrb[21].mxu1 }
 0x240   : > { %1123 = vst [vmem:[%s1909_s25 + $0x20] sm:$0xff] %v1072_v58  ;;  %v1469_v59 = vpop.f32.mrb[22].mxu1 }
 0x241   : > { %1126 = vst [vmem:[%s1909_s25 + $0x38] sm:$0xff] %v1469_v59  ;;  %v1075_v60 = vpop.f32.mrb[23].mxu1 }
 0x242   : > { %1124 = vst [vmem:[%s1909_s25 + $0x28] sm:$0xff] %v1075_v60 }
 0x246   : > { %v1472_v61 = vpop.f32.mrb[24].mxu1 }
 0x247   : > { %1129 = vst [vmem:[%s1909_s25 + $0x50] sm:$0xff] %v1472_v61  ;;  %v1088_v62 = vpop.f32.mrb[25].mxu1 }
 0x248   : > { %1127 = vst [vmem:[%s1909_s25 + $0x40] sm:$0xff] %v1088_v62  ;;  %v1473_v63 = vpop.f32.mrb[26].mxu1 }
 0x249   : > { %1130 = vst [vmem:[%s1909_s25 + $0x58] sm:$0xff] %v1473_v63  ;;  %v1091_v0 = vpop.f32.mrb[27].mxu1 }
 0x24a   : > { %1128 = vst [vmem:[%s1909_s25 + $0x48] sm:$0xff] %v1091_v0 }
 0x24e   : > { %v1476_v1 = vpop.f32.mrb[28].mxu1 }
 0x24f   : > { %1133 = vst [vmem:[%s1909_s25 + $0x70] sm:$0xff] %v1476_v1  ;;  %v1104_v2 = vpop.f32.mrb[29].mxu1 }
 0x250   : > { %1131 = vst [vmem:[%s1909_s25 + $0x60] sm:$0xff] %v1104_v2  ;;  %v1477_v3 = vpop.f32.mrb[30].mxu1 }
 0x251   : > { %1134 = vst [vmem:[%s1909_s25 + $0x78] sm:$0xff] %v1477_v3  ;;  %v1107_v4 = vpop.f32.mrb[31].mxu1 }
 0x252   : > { %1132 = vst [vmem:[%s1909_s25 + $0x68] sm:$0xff] %v1107_v4 }
 0x253   : > { %1587 = shalt.err (!%p1584_p9)
}
 0x254   : > { %s1588_s17 = scalar_lea.hbm %s1929_s27, 2048  ;;  %s1592_s16 = scalar_lea.hbm %s1985_s8, 4096 }
 0x255   : > { %p1589_p10 = scmp.ne.s32.totalorder %s1929_s27, %s1588_s17  ;;  %p1593_p13 = scmp.lt.u32.totalorder %s1929_s27, %s1985_s8 }
 0x256   : > { %p1594_p0 = scmp.lt.u32.totalorder %s1592_s16, %s1588_s17  ;;  %p1596_p2 = scmp.lt.u32.totalorder %s1588_s17, %s1929_s27 }
 0x257   : > { %p1590_p11 = pnand %p1589_p10, %p1734_p5 }
 0x258   : > { %p1595_p1 = por %p1594_p0, %p1593_p13 }
 0x259   : > { %p1591_p12 = pneg %p1590_p11 }
 0x25a   : > { %p1597_p3 = por %p1596_p2, %p1595_p1 }
 0x25c   : > { %p1598_p4 = pnand %p1597_p3, %p1591_p12 }
 0x25e   : > { %1601 = shalt.err (!%p1598_p4)
}
 0x25f   : > { %s1644_s23 = smov 128   ;;  %s1645_s21 = smov 8  }
 0x260   : > { %1478 = dma.vmem_to_hbm [thread:$0]  (%p1734_p5), %s1931_s14, 2048, %s1929_s27, %s1136_s13, %s1644_s23, %s1644_s23, %s1645_s21  }
 0x261 PF: > { %p1489_p7 = scmp.ge.s32.totalorder %s1640_s12, 2  ;;  %s1182_s22 = sand.u32 1, %s1628_s30  }
 0x262   : > { %s1183_s17 = scalar_lea.sflag [#allocation3], %s1182_s22 }
 0x263   : > { %p1483_p8 = pnand %p1489_p7, %p1738_p6 }
 0x265   : > { %1619 = dma.done.wait (!%p1483_p8), %s1183_s17, 2048  }
 0x266   : > { %1621 = vsyncadd (!%p1483_p8), %s1183_s17, 4294965248  ;;  %s1192_s25 = scalar_lea.sflag [#allocation5], %s1182_s22 }
 0x267   : > { %1623 = dma.done.wait (!%p1483_p8), %s1192_s25, 128  }
 0x268   : > { %1625 = vsyncadd (!%p1483_p8), %s1192_s25, 4294967168  ;;  %p23_p5 = scmp.ge.s32.totalorder %s1721_s15, 4   ;;  %s1989_s30 = smov %s1632_s10 }
 0x269   : > { %s1990_s10 = smov %s1636_s11  ;;  %s1991_s11 = smov %s1732_s18 }
 0x26a   : > { %s1992_s12 = smov %s1721_s15  ;;  %25 = sbr.rel (!%p23_p5) target bundleno = 5 (0x5), region = 107 }
 0x271   :  { %1197 = vsyncpa [#allocation3], 1 }
 0x272   :  { %1199 = vsyncpa [#allocation3 + $0x1], 1 }
 0x273   :  { %1200 = vsyncpa [#allocation5], 1 }
 0x274   :  { %1202 = vsyncpa [#allocation5 + $0x1], 1 }

</bundles_post_ra>
